<compile_context>
chip_gen: v5e
topology: v5e:2x2
jax: 0.10.0
libtpu: 0.0.40
codegen_flags: <defaults>
</compile_context>

<pallas_src>
import functools

import jax
import jax.numpy as jnp
from jax import lax
from jax.experimental import pallas as pl
from jax.experimental.pallas import tpu as pltpu


NEG_INF = -1e30


def _round_up(x, m):
    return (x + m - 1) // m * m


def _tile(dim, target, align):
    """Largest multiple of `align` <= target that divides `dim`; falls back to the
    full dim (always a legal BlockSpec block size)."""
    if dim <= target:
        return dim
    t = (target // align) * align
    while t >= align:
        if dim % t == 0:
            return t
        t -= align
    return dim


def _vmem_limit_bytes():
    # Scale the scoped-VMEM budget with the chip: ~90 MiB on 128-MiB parts
    # (v5e/v6e), ~45 MiB on 64-MiB parts (v7x).  Conservative fallback if the
    # info query is unavailable.
    cap = 64 * 1024 * 1024
    try:
        info_cap = pltpu.get_tpu_info().vmem_capacity_bytes
        if info_cap:
            cap = int(info_cap)
    except Exception:
        pass
    return min(96 * 1024 * 1024, int(cap * 0.7))


# ---------------- Pallas kernels ----------------

def matmul_bias_kernel(x_ref, w_ref, b_ref, o_ref, acc_ref):
    # Tiled  o = x @ w + b   (c_attn, bias=True). bf16 MXU operands, f32 accumulation.
    @pl.when(pl.program_id(2) == 0)
    def _():
        acc_ref[...] = jnp.zeros_like(acc_ref)

    acc_ref[...] += jnp.dot(x_ref[...], w_ref[...],
                            preferred_element_type=jnp.float32)

    @pl.when(pl.program_id(2) == pl.num_programs(2) - 1)
    def _():
        o_ref[...] = (acc_ref[...] + b_ref[...]).astype(o_ref.dtype)


def matmul_kernel(x_ref, w_ref, o_ref, acc_ref):
    # Tiled  o = x @ w   (c_proj, bias=False).
    @pl.when(pl.program_id(2) == 0)
    def _():
        acc_ref[...] = jnp.zeros_like(acc_ref)

    acc_ref[...] += jnp.dot(x_ref[...], w_ref[...],
                            preferred_element_type=jnp.float32)

    @pl.when(pl.program_id(2) == pl.num_programs(2) - 1)
    def _():
        o_ref[...] = acc_ref[...].astype(o_ref.dtype)


def rope_kernel(q_ref, k_ref, cos_ref, sin_ref, qo_ref, ko_ref, *, scaling):
    # NeoX rotary on one (rows, head_dim) tile of q and k.  sin_ref holds
    # [-sin, sin] so RoPE is mul + one XLU lane-roll only.  q is additionally
    # pre-scaled by 1/sqrt(head_dim) so the attention kernel never scales the
    # (tq, tkv) score matrix.
    cos = cos_ref[...]
    sin = sin_ref[...]
    q = q_ref[...].astype(jnp.float32)
    k = k_ref[...].astype(jnp.float32)
    half = q.shape[-1] // 2

    q_rot = pltpu.roll(q, shift=half, axis=1)   # [x1, x2] -> [x2, x1]
    k_rot = pltpu.roll(k, shift=half, axis=1)

    qo_ref[...] = ((q * cos + q_rot * sin) * scaling).astype(qo_ref.dtype)
    ko_ref[...] = (k * cos + k_rot * sin).astype(ko_ref.dtype)


def flash_attn_kernel(qi_ref, ki_ref, q_ref, k_ref, v_ref, o_ref,
                      m_ref, l_ref, acc_ref, *, tq, tkv):
    # grid = (heads, lower-triangular tile pairs); online softmax over the kv axis.
    # qi_ref / ki_ref are scalar-prefetched SMEM maps: step -> q-tile / kv-tile.
    s_idx = pl.program_id(1)
    qi = qi_ref[s_idx]
    ki = ki_ref[s_idx]

    @pl.when(ki == 0)
    def _():
        m_ref[...] = jnp.full_like(m_ref, -jnp.inf)
        l_ref[...] = jnp.zeros_like(l_ref)
        acc_ref[...] = jnp.zeros_like(acc_ref)

    q = q_ref[...]              # (tq, hd)  bf16, roped + pre-scaled
    k = k_ref[...]              # (tkv, hd) bf16, roped
    v = v_ref[...]              # (tkv, hd) bf16

    # Contract head_dim axes directly: no transposed copy of k.
    s = lax.dot_general(q, k, (((1,), (1,)), ((), ())),
                        preferred_element_type=jnp.float32)   # (tq, tkv) f32

    def accumulate(scores):
        m_prev = m_ref[...]
        m_new = jnp.maximum(m_prev, jnp.max(scores, axis=-1, keepdims=True))
        alpha = jnp.exp(m_prev - m_new)
        p = jnp.exp(scores - m_new)                            # unnormalized, f32
        l_ref[...] = alpha * l_ref[...] + jnp.sum(p, axis=-1, keepdims=True)
        acc_ref[...] = alpha * acc_ref[...] + jnp.dot(
            p.astype(v.dtype), v, preferred_element_type=jnp.float32)
        m_ref[...] = m_new

    # A kv tile is "full" (entirely below the diagonal) iff its last column is
    # <= the q tile's first row; only diagonal-intersecting tiles build a mask.
    is_full = (ki + 1) * tkv <= qi * tq + 1

    @pl.when(is_full)
    def _():
        accumulate(s)

    @pl.when(jnp.logical_not(is_full))
    def _():
        row = qi * tq + lax.broadcasted_iota(jnp.int32, (tq, 1), 0)
        col = ki * tkv + lax.broadcasted_iota(jnp.int32, (1, tkv), 1)
        accumulate(jnp.where(col <= row, s, NEG_INF))

    last_k = (qi * tq + tq - 1) // tkv
    @pl.when(ki == last_k)
    def _():
        # Deferred normalization: one (tq,1) EUP reciprocal + one (tq,hd) multiply.
        inv_l = pl.reciprocal(l_ref[...], approx=True)
        o_ref[...] = (acc_ref[...] * inv_l).astype(o_ref.dtype)


# ---------------- wrappers ----------------

def _tiled_matmul(x, w, b, out_dtype, *, vmem_limit, big_tiles):
    M, K = x.shape
    _, N = w.shape
    mn_target = 512 if big_tiles else 256
    tm = _tile(M, mn_target, 16)       # bf16 sublane tiling is (16, 128)
    tn = _tile(N, mn_target, 128)
    tk = _tile(K, 1024, 128)
    grid = (M // tm, N // tn, K // tk)

    x_spec = pl.BlockSpec((tm, tk), lambda i, j, k: (i, k))
    w_spec = pl.BlockSpec((tk, tn), lambda i, j, k: (k, j))
    o_spec = pl.BlockSpec((tm, tn), lambda i, j, k: (i, j))
    params = pltpu.CompilerParams(
        dimension_semantics=("parallel", "parallel", "arbitrary"),
        vmem_limit_bytes=vmem_limit)
    scratch = [pltpu.VMEM((tm, tn), jnp.float32)]

    if b is not None:
        b_spec = pl.BlockSpec((1, tn), lambda i, j, k: (0, j))
        return pl.pallas_call(
            matmul_bias_kernel,
            grid=grid,
            in_specs=[x_spec, w_spec, b_spec],
            out_specs=o_spec,
            out_shape=jax.ShapeDtypeStruct((M, N), out_dtype),
            scratch_shapes=scratch,
            compiler_params=params,
        )(x, w, b)
    return pl.pallas_call(
        matmul_kernel,
        grid=grid,
        in_specs=[x_spec, w_spec],
        out_specs=o_spec,
        out_shape=jax.ShapeDtypeStruct((M, N), out_dtype),
        scratch_shapes=scratch,
        compiler_params=params,
    )(x, w)


def qwen_attention(positions, hidden_states, w_qkv, b_qkv, w_proj, *,
                   num_heads, rope_theta=10000.0):
    S, H = hidden_states.shape
    hd = H // num_heads
    scaling = hd ** -0.5
    out_dtype = hidden_states.dtype

    vmem_limit = _vmem_limit_bytes()
    big_tiles = vmem_limit >= 64 * 1024 * 1024

    # Pad the token axis so every kernel keeps large, aligned tiles.  Padded rows
    # sit causally *after* every real token, so the causal mask keeps them from
    # influencing real outputs; their (finite) rows are sliced off at the end.
    pad_base = 8 if S < 128 else 128
    S_pad = _round_up(S, pad_base)
    if S_pad != S:
        hidden_states = jnp.pad(hidden_states, ((0, S_pad - S), (0, 0)))
        positions = jnp.pad(positions, (0, S_pad - S))

    # bf16 MXU operands, f32 accumulation everywhere.
    x = hidden_states.astype(jnp.bfloat16)
    wq = w_qkv.astype(jnp.bfloat16)
    wp = w_proj.astype(jnp.bfloat16)
    b = b_qkv.reshape(1, 3 * H).astype(jnp.float32)

    # c_attn: tiled QKV projection -> (S_pad, 3H) bf16, columns laid out [q | k | v].
    qkv = _tiled_matmul(x, wq, b, jnp.bfloat16,
                        vmem_limit=vmem_limit, big_tiles=big_tiles)

    # Rotary tables (NeoX style, rotary_dim == head_dim); sin sign folded in.
    inv_freq = 1.0 / (rope_theta ** (jnp.arange(0, hd, 2, dtype=jnp.float32) / hd))
    freqs = positions.astype(jnp.float32)[:, None] * inv_freq[None, :]      # (S_pad, hd/2)
    cos_tab = jnp.concatenate([jnp.cos(freqs), jnp.cos(freqs)], axis=-1)    # (S_pad, hd)
    sin_tab = jnp.concatenate([-jnp.sin(freqs), jnp.sin(freqs)], axis=-1)   # (S_pad, hd)

    # RoPE (+ q pre-scaling), once per element, reading heads straight out of qkv.
    # Heads are the innermost grid axis so cos/sin blocks stay resident across heads.
    ts = _tile(S_pad, 512, 16)
    q_rot, k_rot = pl.pallas_call(
        functools.partial(rope_kernel, scaling=scaling),
        grid=(S_pad // ts, num_heads),
        in_specs=[
            pl.BlockSpec((ts, hd), lambda si, h: (si, h)),                  # q columns
            pl.BlockSpec((ts, hd), lambda si, h: (si, num_heads + h)),      # k columns
            pl.BlockSpec((ts, hd), lambda si, h: (si, 0)),                  # cos
            pl.BlockSpec((ts, hd), lambda si, h: (si, 0)),                  # sin
        ],
        out_specs=[
            pl.BlockSpec((ts, hd), lambda si, h: (si, h)),
            pl.BlockSpec((ts, hd), lambda si, h: (si, h)),
        ],
        out_shape=[jax.ShapeDtypeStruct((S_pad, H), jnp.bfloat16),
                   jax.ShapeDtypeStruct((S_pad, H), jnp.bfloat16)],
        compiler_params=pltpu.CompilerParams(
            dimension_semantics=("parallel", "arbitrary"),
            vmem_limit_bytes=vmem_limit),
    )(qkv, qkv, cos_tab, sin_tab)

    # Flash attention (causal prefill).  Collapse (qi, ki) into one grid axis that
    # only enumerates lower-triangular tile pairs: no dead grid steps, no clamp.
    tq = _tile(S_pad, 512, 16)
    tkv = _tile(S_pad, 256, 16)
    nq = S_pad // tq

    qi_list, ki_list = [], []
    for qi in range(nq):
        last_k = (qi * tq + tq - 1) // tkv
        for ki in range(last_k + 1):
            qi_list.append(qi)
            ki_list.append(ki)
    qi_map = jnp.asarray(qi_list, dtype=jnp.int32)
    ki_map = jnp.asarray(ki_list, dtype=jnp.int32)
    n_steps = len(qi_list)

    attn_out = pl.pallas_call(
        functools.partial(flash_attn_kernel, tq=tq, tkv=tkv),
        grid_spec=pltpu.PrefetchScalarGridSpec(
            num_scalar_prefetch=2,
            grid=(num_heads, n_steps),
            in_specs=[
                pl.BlockSpec((tq, hd), lambda h, s, qi_m, ki_m: (qi_m[s], h)),
                pl.BlockSpec((tkv, hd), lambda h, s, qi_m, ki_m: (ki_m[s], h)),
                pl.BlockSpec((tkv, hd),
                             lambda h, s, qi_m, ki_m: (ki_m[s], 2 * num_heads + h)),
            ],
            out_specs=pl.BlockSpec((tq, hd), lambda h, s, qi_m, ki_m: (qi_m[s], h)),
            scratch_shapes=[
                pltpu.VMEM((tq, 1), jnp.float32),    # running row max  m
                pltpu.VMEM((tq, 1), jnp.float32),    # running row sum  l
                pltpu.VMEM((tq, hd), jnp.float32),   # unnormalized output accumulator
            ],
        ),
        out_shape=jax.ShapeDtypeStruct((S_pad, H), jnp.bfloat16),
        compiler_params=pltpu.CompilerParams(
            dimension_semantics=("parallel", "arbitrary"),
            vmem_limit_bytes=vmem_limit),
    )(qi_map, ki_map, q_rot, k_rot, qkv)

    # c_proj: tiled output projection, consumes the lane-dense (S_pad, H) slab.
    out = _tiled_matmul(attn_out, wp, None, out_dtype,
                        vmem_limit=vmem_limit, big_tiles=big_tiles)
    if S_pad != S:
        out = out[:S]
    return out


# ---------------- demo ----------------

if __name__ == "__main__":
    hidden_size = 256
    num_heads = 2            # head_dim = 128 (lane-aligned)
    seq = 8
    rope_theta = 10000.0

    key = jax.random.PRNGKey(0)
    k1, k2, k3, k4 = jax.random.split(key, 4)

    hidden_states = jax.random.normal(k1, (seq, hidden_size), jnp.float32)
    positions = jnp.arange(seq, dtype=jnp.int32)

    # Deterministic synthetic parameters (shapes follow QWenAttention.__init__,
    # stored pre-transposed as (in_features, out_features) for the kernels).
    w_qkv = jax.random.normal(k2, (hidden_size, 3 * hidden_size), jnp.float32) * 0.05
    b_qkv = jax.random.normal(k3, (3 * hidden_size,), jnp.float32) * 0.05
    w_proj = jax.random.normal(k4, (hidden_size, hidden_size), jnp.float32) * 0.05

    out = qwen_attention(positions, hidden_states, w_qkv, b_qkv, w_proj,
                         num_heads=num_heads, rope_theta=rope_theta)
    jax.block_until_ready(out)
    assert out.shape == (seq, hidden_size)
    assert bool(jnp.all(jnp.isfinite(out)))
    print("KERNEL_OK")
</pallas_src>

<mosaic_0001>
module attributes {stable_mosaic.version = 11 : i64} {
  func.func @matmul_bias_kernel(%arg0: i32, %arg1: i32, %arg2: i32, %arg3: memref<8x256xbf16, #tpu.memory_space<vmem>>, %arg4: memref<256x256xbf16, #tpu.memory_space<vmem>>, %arg5: memref<1x256xf32, #tpu.memory_space<vmem>>, %arg6: memref<8x256xbf16, #tpu.memory_space<vmem>>, %arg7: memref<8x256xf32, #tpu.memory_space<vmem>>) attributes {dimension_semantics = [#tpu.dimension_semantics<parallel>, #tpu.dimension_semantics<parallel>, #tpu.dimension_semantics<arbitrary>], iteration_bounds = array<i64: 1, 3, 1>, scalar_prefetch = 0 : i64, scratch_operands = 1 : i64, tpu.core_type = #tpu.core_type<tc>, window_params = [{transform_indices = @transform_0, window_bounds = array<i64: 8, 256>}, {transform_indices = @transform_1, window_bounds = array<i64: 256, 256>}, {transform_indices = @transform_2, window_bounds = array<i64: 1, 256>}, {transform_indices = @transform_3, window_bounds = array<i64: 8, 256>}]} {
    %c0_i32 = arith.constant 0 : i32
    %0 = arith.cmpi eq, %arg2, %c0_i32 : i32
    %1 = arith.extui %0 : i1 to i32
    %c0_i32_0 = arith.constant 0 : i32
    %2 = arith.cmpi ne, %1, %c0_i32_0 : i32
    scf.if %2 {
      %cst_10 = arith.constant 0.000000e+00 : f32
      %12 = vector.broadcast %cst_10 : f32 to vector<8x256xf32>
      %c0_11 = arith.constant 0 : index
      %c0_12 = arith.constant 0 : index
      %13 = vector.load %arg7[%c0_11, %c0_12] : memref<8x256xf32, #tpu.memory_space<vmem>>, vector<8x256xf32>
      tpu.vector_store %arg7[%c0_11, %c0_12], %12 {strides = array<i32>} : memref<8x256xf32, #tpu.memory_space<vmem>>, vector<8x256xf32>,
    } else {
    }
    %c0 = arith.constant 0 : index
    %c0_1 = arith.constant 0 : index
    %3 = vector.load %arg7[%c0, %c0_1] : memref<8x256xf32, #tpu.memory_space<vmem>>, vector<8x256xf32>
    %c0_2 = arith.constant 0 : index
    %c0_3 = arith.constant 0 : index
    %4 = vector.load %arg3[%c0_2, %c0_3] : memref<8x256xbf16, #tpu.memory_space<vmem>>, vector<8x256xbf16>
    %c0_4 = arith.constant 0 : index
    %c0_5 = arith.constant 0 : index
    %5 = vector.load %arg4[%c0_4, %c0_5] : memref<256x256xbf16, #tpu.memory_space<vmem>>, vector<256x256xbf16>
    %cst = arith.constant dense<0.000000e+00> : vector<8x256xf32>
    %6 = tpu.matmul %4, %5, %cst {dimension_numbers = #tpu.dot_dimension_numbers<[1], [0], [0], [1], [0, 0, 1, 1], [], []>} : vector<8x256xbf16>, vector<256x256xbf16>, vector<8x256xf32> -> vector<8x256xf32>
    %7 = arith.addf %3, %6 : vector<8x256xf32>
    %c0_6 = arith.constant 0 : index
    %c0_7 = arith.constant 0 : index
    %8 = vector.load %arg7[%c0_6, %c0_7] : memref<8x256xf32, #tpu.memory_space<vmem>>, vector<8x256xf32>
    tpu.vector_store %arg7[%c0_6, %c0_7], %7 {strides = array<i32>} : memref<8x256xf32, #tpu.memory_space<vmem>>, vector<8x256xf32>,
    %c0_i32_8 = arith.constant 0 : i32
    %9 = arith.cmpi eq, %arg2, %c0_i32_8 : i32
    %10 = arith.extui %9 : i1 to i32
    %c0_i32_9 = arith.constant 0 : i32
    %11 = arith.cmpi ne, %10, %c0_i32_9 : i32
    scf.if %11 {
      %c0_10 = arith.constant 0 : index
      %c0_11 = arith.constant 0 : index
      %12 = vector.load %arg7[%c0_10, %c0_11] : memref<8x256xf32, #tpu.memory_space<vmem>>, vector<8x256xf32>
      %c0_12 = arith.constant 0 : index
      %c0_13 = arith.constant 0 : index
      %13 = vector.load %arg5[%c0_12, %c0_13] : memref<1x256xf32, #tpu.memory_space<vmem>>, vector<1x256xf32>
      %14 = vector.broadcast %13 : vector<1x256xf32> to vector<8x256xf32>
      %15 = arith.addf %12, %14 : vector<8x256xf32>
      %16 = arith.truncf %15 : vector<8x256xf32> to vector<8x256xbf16>
      %c0_14 = arith.constant 0 : index
      %c0_15 = arith.constant 0 : index
      %17 = vector.load %arg6[%c0_14, %c0_15] : memref<8x256xbf16, #tpu.memory_space<vmem>>, vector<8x256xbf16>
      tpu.vector_store %arg6[%c0_14, %c0_15], %16 {strides = array<i32>} : memref<8x256xbf16, #tpu.memory_space<vmem>>, vector<8x256xbf16>,
    } else {
    }
    return
  }
  func.func @transform_0(%arg0: i32, %arg1: i32, %arg2: i32) -> (i32, i32) {
    %c0_i32 = arith.constant 0 : i32
    return %arg0, %arg2 : i32, i32
  }
  func.func @transform_1(%arg0: i32, %arg1: i32, %arg2: i32) -> (i32, i32) {
    %c0_i32 = arith.constant 0 : i32
    return %arg2, %arg1 : i32, i32
  }
  func.func @transform_2(%arg0: i32, %arg1: i32, %arg2: i32) -> (i32, i32) {
    %c0_i32 = arith.constant 0 : i32
    %c0_i32_0 = arith.constant 0 : i32
    return %c0_i32, %arg1 : i32, i32
  }
  func.func @transform_3(%arg0: i32, %arg1: i32, %arg2: i32) -> (i32, i32) {
    %c0_i32 = arith.constant 0 : i32
    return %arg0, %arg1 : i32, i32
  }
}

</mosaic_0001>

<bundles_post_ra>
// kernel: tpu_custom_call.1
= control target key start
LH: loop header
LB: loop body
LE: loop exit
PB: predicated region body
PF: predicated region fallthrough
CT: control target
= control target key end

     0   :  { %8 = vsyncpa [#allocation4], 0  ;;  %s1410_s0 = inlined_call_operand.hbm [shape: bf16[8,256], index: 0, kind: input, shape index: {}]   ;;  %s1411_s1 = inlined_call_operand.hbm [shape: bf16[256,768], index: 1, kind: input, shape index: {}]   ;;  %s1412_s2 = inlined_call_operand.hbm [shape: f32[1,768], index: 2, kind: input, shape index: {}]   ;;  %s1413_s3 = inlined_call_operand.hbm [shape: bf16[8,768], index: 3, kind: output, shape index: {}]  }
   0x1   :  { %9 = vsyncpa [#allocation7], 0 }
   0x2   :  { %11 = vsyncpa [#allocation7 + $0x1], 0 }
   0x3   :  { %12 = vsyncpa [#allocation5], 0 }
   0x4   :  { %14 = vsyncpa [#allocation5 + $0x1], 0  ;;  %s1172_s12 = smov 0   ;;  %s1174_s13 = smov 0  }
   0x5   :  { %s1176_s14 = smov 0   ;;  %s1178_s15 = smov 0  }
   0x6   :  { %s1180_s16 = smov 0   ;;  %s1182_s17 = smov 0  }
   0x7 LB: > { %s35_s18 = sadd.s32 1, %s1142_s16  ;;  %s76_s19 = sadd.s32 1, %s1134_s14  ;;  %s1146_s17 = sphi %s1182_s17, %s20_s17   ;;  %s1142_s16 = sphi %s1180_s16, %s1424_s16   ;;  %s1138_s15 = sphi %s1178_s15, %s1423_s15   ;;  %s1134_s14 = sphi %s1176_s14, %s1422_s14   ;;  %s1130_s13 = sphi %s1174_s13, %s1421_s13   ;;  %s1126_s12 = sphi %s1172_s12, %s1420_s12  }
   0x8   : > { %p37_p0 = scmp.ge.s32.totalorder %s35_s18, 3  ;;  %p83_p1 = scmp.ne.s32.totalorder %s1134_s14, %s1130_s13 }
   0x9   : > { %p84_p2 = scmp.eq.s32.totalorder %s1146_s17, 0  ;;  %p915_p4 = scmp.lt.s32.totalorder %s1146_s17, 3 }
   0xa   : > { %s1426_s18 = smov (%p37_p0, %s35_s18), 0  ;;  %s184_s22 = sand.u32 1, %s1146_s17  }
   0xb   : > { %p1212_p3 = por %p84_p2, %p83_p1  ;;  %s72_s21 = ssub.s32 %s1142_s16, %s1426_s18 }
   0xc   : > { %p74_p5 = scmp.eq.s32.totalorder %s72_s21, 0  ;;  %s186_s23 = sand.u32 1, %s1134_s14  }
   0xd   : > { %s855_s24 = sshll.u32 %s1142_s16, 3  ;;  %s712_s26 = sshll.u32 %s186_s23, 8 }
   0xe   : > { %s1223_s25 = scalar_select %p74_p5, %s1134_s14, %s76_s19  }
   0xf   : > { %s196_s29 = scalar_lea.hbm %s1411_s1, %s855_s24  ;;  %s188_s4 = scalar_lea.vmem [#allocation6], %s712_s26 }
  0x10   : > { %s197_s30 = sshll.u32 %s196_s29, 4  ;;  %s199_s5 = sshll.u32 %s188_s4, 4  ;;  %s198_s30 = int_to_ptr.hbm [resolvable:$true] %s197_s30  ;;  %s200_s5 = int_to_ptr.vmem [resolvable:$true] %s199_s5 }
  0x11   : > { %p1234_p6 = pnand %p915_p4, %p1212_p3  ;;  %s1238_s7 = scalar_lea.sflag [#allocation7], %s184_s22 }
  0x12   : > { %s1148_s8 = smov 384   ;;  %s1149_s9 = smov 128  }
  0x13   : > { %s1150_s10 = smov 8   ;;  %s1244_s11 = sadd.s32 4294967295, %s1146_s17  }
  0x14   : > { %906 = dma.hbm_to_vmem [thread:$0]  (!%p1234_p6), %s198_s30, 4096, %s200_s5, %s1238_s7, %s1148_s8, %s1149_s9, %s1150_s10  }
  0x15   : > { %s708_s19 = sadd.s32 4294967294, %s1146_s17   ;;  %p89_p7 = scmp.ne.s32.totalorder %s1130_s13, %s1126_s12 }
  0x16   : > { %p90_p8 = scmp.eq.s32.totalorder %s1244_s11, 0  ;;  %p141_p9 = scmp.eq.s32.totalorder %s1244_s11, 2 }
  0x17   : > { %p147_p10 = scmp.eq.s32.totalorder %s708_s19, 2  ;;  %p709_p12 = scmp.ge.s32.totalorder %s1146_s17, 1 }
  0x18   : > { %p1253_p11 = por %p90_p8, %p89_p7  ;;  %p1261_p13 = por %p141_p9, %p83_p1 }
  0x19   : > { %p1265_p0 = por %p147_p10, %p89_p7  ;;  %p154_p2 = scmp.lt.s32.totalorder %s1146_s17, 4 }
  0x1a   : > { %s171_s27 = sshll.u32 %s1410_s0, 4  ;;  %s1151_s29 = smov [#allocation3]   ;;  %s172_s27 = int_to_ptr.hbm [resolvable:$true] %s171_s27 }
  0x1b   : > { %p1273_p3 = pnand %p709_p12, %p154_p2  ;;  %s173_s30 = sshll.u32 %s1151_s29, 4  ;;  %s174_s30 = int_to_ptr.vmem [resolvable:$true] %s173_s30 }
  0x1c   : > { %s715_s4 = sshll.u32 %s186_s23, 1  ;;  %s716_s5 = sshll.u32 %s1142_s16, 1 }
  0x1d   : > { %p899_p1 = pneg %p1273_p3  ;;  %s217_s10 = scalar_lea.hbm %s1412_s2, %s716_s5 }
  0x1e   : > { %s219_s19 = sshll.u32 %s217_s10, 4  ;;  %s213_s24 = scalar_lea.vmem [#allocation8], %s715_s4  ;;  %s220_s19 = int_to_ptr.hbm [resolvable:$true] %s219_s19 }
  0x1f   : > { %p900_p4 = pnand %p899_p1, %p90_p8  ;;  %s221_s26 = sshll.u32 %s213_s24, 4  ;;  %s222_s26 = int_to_ptr.vmem [resolvable:$true] %s221_s26 }
  0x20   : > { %909 = dma.hbm_to_vmem [thread:$0]  (!%p1234_p6), %s220_s19, 32, %s222_s26, %s1238_s7  }
  0x21   : > { %902 = dma.hbm_to_vmem [thread:$0]  (!%p900_p4), %s172_s27, 128, %s174_s30, [#allocation4]  }
  0x22   : > { %230 = sbr.rel (%p1273_p3) target bundleno = 223 (0xdf), region = 32 }
  0x27   : > { %1113 = dma.done.wait (%p90_p8), [#allocation4], 128  }
  0x28   : > { %1115 = vsyncadd (%p90_p8), [#allocation4], 4294967168  ;;  %s237_s23 = sand.u32 1, %s1244_s11   ;;  %s1298_s29 = sand.u32 1, %s1130_s13  }
  0x29   : > { %s719_s27 = sshll.u32 %s1298_s29, 8  ;;  %s238_s30 = scalar_lea.sflag [#allocation7], %s237_s23 }
  0x2a   : > { %s1301_s6 = scalar_lea.vmem [#allocation6], %s719_s27 }
  0x2b   : > { %1117 = dma.done.wait (%p1253_p11), %s238_s30, 4128  }
  0x2c   : > { %1119 = vsyncadd (%p1253_p11), %s238_s30, 4294963168  ;;  %v780_v0 = vld [vmem:[%s1301_s6 + $0x70] sm:$0xf]  ;;  %v871_v1 = vld [vmem:[%s1301_s6 + $0x74] sm:$0xf0]  ;;  %s720_s7 = sshll.u32 %s1298_s29, 1 }
  0x2d   : > { %v844_v2 = vld [vmem:[%s1301_s6 + $0xf0] sm:$0xf]  ;;  %v781_v3 = vor.u32 %v871_v1, %v780_v0  ;;  %v887_v4 = vld [vmem:[%s1301_s6 + $0xf4] sm:$0xf0]  ;;  %v870_v5 = vld [vmem:[%s1301_s6 + $0x74] sm:$0xf] }
  0x2e   : > { %v782_v6 = vld [vmem:[%s1301_s6 + $0x78] sm:$0xf0]  ;;  %v845_v7 = vor.u32 %v887_v4, %v844_v2  ;;  %v886_v9 = vld [vmem:[%s1301_s6 + $0xf4] sm:$0xf]  ;;  %v772_v11 = vld [vmem:[%s1301_s6 + $0x60] sm:$0xf] }
  0x2f   : > { %v785_v8 = vor.u32 %v870_v5, %v782_v6  ;;  %v846_v10 = vld [vmem:[%s1301_s6 + $0xf8] sm:$0xf0]  ;;  %493 = vmatpush.bf16.msra.mxu0 %v781_v3  ;;  %v869_v13 = vld [vmem:[%s1301_s6 + $0x64] sm:$0xf0]  ;;  %v836_v14 = vld [vmem:[%s1301_s6 + $0xe0] sm:$0xf] }
  0x30   : > { %v849_v12 = vor.u32 %v886_v9, %v846_v10  ;;  %v885_v15 = vld [vmem:[%s1301_s6 + $0xe4] sm:$0xf0]  ;;  %506 = vmatpush.bf16.msra.mxu1 %v845_v7  ;;  %v773_v16 = vor.u32 %v869_v13, %v772_v11  ;;  %v868_v18 = vld [vmem:[%s1301_s6 + $0x64] sm:$0xf]  ;;  %v774_v19 = vld [vmem:[%s1301_s6 + $0x68] sm:$0xf0] }
  0x31   : > { %519 = vmatpush.bf16.msra.mxu2 %v785_v8  ;;  %v837_v17 = vor.u32 %v885_v15, %v836_v14  ;;  %v884_v20 = vld [vmem:[%s1301_s6 + $0xe4] sm:$0xf]  ;;  %v777_v21 = vor.u32 %v868_v18, %v774_v19  ;;  %v838_v22 = vld [vmem:[%s1301_s6 + $0xe8] sm:$0xf0]  ;;  %v764_v23 = vld [vmem:[%s1301_s6 + $0x50] sm:$0xf] }
  0x32   : > { %532 = vmatpush.bf16.msra.mxu3 %v849_v12  ;;  %v867_v24 = vld [vmem:[%s1301_s6 + $0x54] sm:$0xf0]  ;;  %v841_v25 = vor.u32 %v884_v20, %v838_v22  ;;  %v828_v26 = vld [vmem:[%s1301_s6 + $0xd0] sm:$0xf]  ;;  %v866_v28 = vld [vmem:[%s1301_s6 + $0x54] sm:$0xf] }
  0x33   : > { %v883_v27 = vld [vmem:[%s1301_s6 + $0xd4] sm:$0xf0]  ;;  %494 = vmatpush.bf16.msra.mxu0 %v773_v16  ;;  %v765_v29 = vor.u32 %v867_v24, %v764_v23  ;;  %v766_v30 = vld [vmem:[%s1301_s6 + $0x58] sm:$0xf0]  ;;  %v882_v31 = vld [vmem:[%s1301_s6 + $0xd4] sm:$0xf] }
  0x34   : > { %v830_v32 = vld [vmem:[%s1301_s6 + $0xd8] sm:$0xf0]  ;;  %507 = vmatpush.bf16.msra.mxu1 %v837_v17  ;;  %v829_v33 = vor.u32 %v883_v27, %v828_v26  ;;  %v769_v34 = vor.u32 %v866_v28, %v766_v30  ;;  %v756_v35 = vld [vmem:[%s1301_s6 + $0x40] sm:$0xf]  ;;  %v865_v36 = vld [vmem:[%s1301_s6 + $0x44] sm:$0xf0] }
  0x35   : > { %520 = vmatpush.bf16.msra.mxu2 %v777_v21  ;;  %v820_v37 = vld [vmem:[%s1301_s6 + $0xc0] sm:$0xf]  ;;  %v833_v38 = vor.u32 %v882_v31, %v830_v32  ;;  %v881_v39 = vld [vmem:[%s1301_s6 + $0xc4] sm:$0xf0]  ;;  %v864_v40 = vld [vmem:[%s1301_s6 + $0x44] sm:$0xf]  ;;  %v757_v44 = vor.u32 %v865_v36, %v756_v35 }
  0x36   : > { %533 = vmatpush.bf16.msra.mxu3 %v841_v25  ;;  %v758_v41 = vld [vmem:[%s1301_s6 + $0x48] sm:$0xf0]  ;;  %v880_v42 = vld [vmem:[%s1301_s6 + $0xc4] sm:$0xf]  ;;  %v821_v45 = vor.u32 %v881_v39, %v820_v37  ;;  %v748_v47 = vld [vmem:[%s1301_s6 + $0x30] sm:$0xf] }
  0x37   : > { %v822_v43 = vld [vmem:[%s1301_s6 + $0xc8] sm:$0xf0]  ;;  %495 = vmatpush.bf16.msra.mxu0 %v765_v29  ;;  %v761_v46 = vor.u32 %v864_v40, %v758_v41  ;;  %v863_v48 = vld [vmem:[%s1301_s6 + $0x34] sm:$0xf0]  ;;  %v812_v49 = vld [vmem:[%s1301_s6 + $0xb0] sm:$0xf] }
  0x38   : > { %508 = vmatpush.bf16.msra.mxu1 %v829_v33  ;;  %v825_v50 = vor.u32 %v880_v42, %v822_v43  ;;  %v879_v51 = vld [vmem:[%s1301_s6 + $0xb4] sm:$0xf0]  ;;  %v862_v52 = vld [vmem:[%s1301_s6 + $0x34] sm:$0xf]  ;;  %v750_v53 = vld [vmem:[%s1301_s6 + $0x38] sm:$0xf0]  ;;  %v749_v56 = vor.u32 %v863_v48, %v748_v47 }
  0x39   : > { %521 = vmatpush.bf16.msra.mxu2 %v769_v34  ;;  %v878_v54 = vld [vmem:[%s1301_s6 + $0xb4] sm:$0xf]  ;;  %v814_v55 = vld [vmem:[%s1301_s6 + $0xb8] sm:$0xf0]  ;;  %v813_v57 = vor.u32 %v879_v51, %v812_v49  ;;  %v753_v58 = vor.u32 %v862_v52, %v750_v53  ;;  %v740_v59 = vld [vmem:[%s1301_s6 + $0x20] sm:$0xf] }
  0x3a   : > { %534 = vmatpush.bf16.msra.mxu3 %v833_v38  ;;  %v861_v60 = vld [vmem:[%s1301_s6 + $0x24] sm:$0xf0]  ;;  %v804_v61 = vld [vmem:[%s1301_s6 + $0xa0] sm:$0xf]  ;;  %v817_v62 = vor.u32 %v878_v54, %v814_v55  ;;  %v860_v0 = vld [vmem:[%s1301_s6 + $0x24] sm:$0xf] }
  0x3b   : > { %496 = vmatpush.bf16.msra.mxu0 %v757_v44  ;;  %v877_v63 = vld [vmem:[%s1301_s6 + $0xa4] sm:$0xf0]  ;;  %v742_v1 = vld [vmem:[%s1301_s6 + $0x28] sm:$0xf0]  ;;  %v876_v2 = vld [vmem:[%s1301_s6 + $0xa4] sm:$0xf]  ;;  %v741_v4 = vor.u32 %v861_v60, %v740_v59 }
  0x3c   : > { %509 = vmatpush.bf16.msra.mxu1 %v821_v45  ;;  %v806_v3 = vld [vmem:[%s1301_s6 + $0xa8] sm:$0xf0]  ;;  %v805_v5 = vor.u32 %v877_v63, %v804_v61  ;;  %v745_v6 = vor.u32 %v860_v0, %v742_v1  ;;  %v732_v7 = vld [vmem:[%s1301_s6 + $0x10] sm:$0xf]  ;;  %v859_v8 = vld [vmem:[%s1301_s6 + $0x14] sm:$0xf0] }
  0x3d   : > { %522 = vmatpush.bf16.msra.mxu2 %v761_v46  ;;  %v796_v9 = vld [vmem:[%s1301_s6 + $0x90] sm:$0xf]  ;;  %v809_v10 = vor.u32 %v876_v2, %v806_v3  ;;  %v875_v11 = vld [vmem:[%s1301_s6 + $0x94] sm:$0xf0]  ;;  %v858_v12 = vld [vmem:[%s1301_s6 + $0x14] sm:$0xf]  ;;  %v733_v16 = vor.u32 %v859_v8, %v732_v7 }
  0x3e   : > { %535 = vmatpush.bf16.msra.mxu3 %v825_v50  ;;  %v734_v13 = vld [vmem:[%s1301_s6 + $0x18] sm:$0xf0]  ;;  %v874_v14 = vld [vmem:[%s1301_s6 + $0x94] sm:$0xf]  ;;  %v797_v18 = vor.u32 %v875_v11, %v796_v9  ;;  %v724_v20 = vld [vmem:[%s1301_s6] sm:$0xf] }
  0x3f   : > { %497 = vmatpush.bf16.msra.mxu0 %v749_v56  ;;  %v798_v15 = vld [vmem:[%s1301_s6 + $0x98] sm:$0xf0]  ;;  %v737_v19 = vor.u32 %v858_v12, %v734_v13  ;;  %v857_v21 = vld [vmem:[%s1301_s6 + $0x4] sm:$0xf0]  ;;  %v788_v22 = vld [vmem:[%s1301_s6 + $0x80] sm:$0xf] }
  0x40   : > { %510 = vmatpush.bf16.msra.mxu1 %v813_v57  ;;  %v293_v17 = vld [vmem:[#allocation3] sm:$0xff]  ;;  %v801_v23 = vor.u32 %v874_v14, %v798_v15  ;;  %v873_v24 = vld [vmem:[%s1301_s6 + $0x84] sm:$0xf0]  ;;  %v856_v25 = vld [vmem:[%s1301_s6 + $0x4] sm:$0xf]  ;;  %v725_v30 = vor.u32 %v857_v21, %v724_v20  ;;  %s251_s11 = scalar_lea.vmem [#allocation8], %s720_s7 }
  0x41   : > { %523 = vmatpush.bf16.msra.mxu2 %v753_v58  ;;  %v726_v26 = vld [vmem:[%s1301_s6 + $0x8] sm:$0xf0]  ;;  %v872_v27 = vld [vmem:[%s1301_s6 + $0x84] sm:$0xf]  ;;  %v327_v29 = vunpack.c.l.b16 %v293_v17  ;;  %v328_v31 = vunpack.c.h.b16 %v293_v17  ;;  %v789_v32 = vor.u32 %v873_v24, %v788_v22  ;;  %v554_v39 = vld [vmem:[%s251_s11] sm:$0x3] }
  0x42   : > { %536 = vmatpush.bf16.msra.mxu3 %v817_v62  ;;  %v790_v28 = vld [vmem:[%s1301_s6 + $0x88] sm:$0xf0]  ;;  %v729_v33 = vor.u32 %v856_v25, %v726_v26  ;;  %s721_s20 = sshll.u32 %s1298_s29, 3  ;;  %s888_s28 = sshll.u32 %s1138_s15, 3  ;;  %v556_v41 = vperm.slane %v554_v39, 0  ;;  %v557_v43 = vperm.slane %v554_v39, 1 }
  0x43   : > { %498 = vmatpush.bf16.msra.mxu0 %v741_v4  ;;  %v793_v34 = vor.u32 %v872_v27, %v790_v28  ;;  %v329_v35 = vpack.c.b16 %v327_v29, %v327_v29  ;;  %v330_v36 = vpack.c.b16 %v328_v31, %v328_v31  ;;  %s578_s8 = scalar_lea.hbm %s1413_s3, %s888_s28  ;;  %s279_s9 = scalar_lea.vmem [#allocation9], %s721_s20 }
  0x44   : > { %511 = vmatpush.bf16.msra.mxu1 %v805_v5  ;;  %s580_s10 = sshll.u32 %s279_s9, 4  ;;  %s582_s19 = sshll.u32 %s578_s8, 4  ;;  %s581_s10 = int_to_ptr.vmem [resolvable:$true] %s580_s10  ;;  %s583_s19 = int_to_ptr.hbm [resolvable:$true] %s582_s19 }
  0x45   : > { %524 = vmatpush.bf16.msra.mxu2 %v745_v6  ;;  %s565_s15 = scalar_lea.sflag [#allocation5], %s1298_s29  ;;  %s1074_s24 = sshra.s32 %s583_s19, 4  ;;  %s1075_s24 = int_to_ptr.hbm [resolvable:$true] %s1074_s24 }
  0x46   : > { %537 = vmatpush.bf16.msra.mxu3 %v809_v10  ;;  %s1076_s26 = scalar_lea.hbm %s1075_s24, 8  ;;  %s1080_s30 = scalar_lea.hbm %s1413_s3, 24 }
  0x47   : > { %499 = vmatpush.bf16.msra.mxu0 %v733_v16  ;;  %p1077_p5 = scmp.ne.s32.totalorder %s1075_s24, %s1076_s26  ;;  %p1081_p8 = scmp.lt.s32.totalorder %s1075_s24, %s1413_s3 }
  0x48   : > { %512 = vmatpush.bf16.msra.mxu1 %v797_v18  ;;  %p1082_p9 = scmp.lt.s32.totalorder %s1080_s30, %s1076_s26 }
  0x49   : > { %525 = vmatpush.bf16.msra.mxu2 %v737_v19  ;;  %p1078_p6 = pnand %p1077_p5, %p1261_p13 }
  0x4a   : > { %538 = vmatpush.bf16.msra.mxu3 %v801_v23  ;;  %p1083_p10 = por %p1082_p9, %p1081_p8 }
  0x4b   : > { %500 = vmatpush.bf16.msra.mxu0 %v725_v30  ;;  %p1079_p7 = pneg %p1078_p6 }
  0x4c   : > { %513 = vmatpush.bf16.msra.mxu1 %v789_v32 }
  0x4d   : > { %526 = vmatpush.bf16.msra.mxu2 %v729_v33  ;;  %p1084_p11 = pnand %p1083_p10, %p1079_p7 }
  0x4e   : > { %539 = vmatpush.bf16.msra.mxu3 %v793_v34  ;;  %501 = vmatmul.bf16.vlgmr.msra.gmra.mxu0 %v329_v35 }
  0x4f   : > { %514 = vmatmul.bf16.vlgmr.msra.gmra.mxu1 %v330_v36 }
  0x50   : > { %527 = vmatmul.bf16.vlgmr.msra.gmra.mxu2 %v329_v35 }
  0x51   : > { %540 = vmatmul.bf16.vlgmr.msra.gmra.mxu3 %v330_v36 }
  0xcb   : > { %v502_v37 = vpop.f32.mrf.mxu0 }
  0xcc   : > { %v515_v38 = vpop.f32.mrf.mxu1 }
  0xcd   : > { %v516_v40 = vadd.f32 %v515_v38, %v502_v37 }
  0xcf   : > { %v560_v46 = vadd.f32 %v556_v41, %v516_v40 }
  0xd3   : > { %v528_v42 = vpop.f32.mrf.mxu2  ;;  %v504_v45 = vpop.f32.mrf.mxu0 }
  0xd4   : > { %v541_v44 = vpop.f32.mrf.mxu3  ;;  %v517_v48 = vpop.f32.mrf.mxu1 }
  0xd5   : > { %v542_v47 = vadd.f32 %v541_v44, %v528_v42 }
  0xd7   : > { %v561_v49 = vadd.f32 %v557_v43, %v542_v47 }
  0xd9   : > { %v562_v50 = vpack.c.bf16 %v561_v49, %v560_v46 }
  0xdb   : > { %v530_v51 = vpop.f32.mrf.mxu2  ;;  %563 = vst [vmem:[%s279_s9] sm:$0xff] %v562_v50 }
  0xdc   : > { %v543_v52 = vpop.f32.mrf.mxu3 }
  0xdd   : > { %1087 = shalt.err (!%p1084_p11)
}
  0xde   : > { %897 = dma.vmem_to_hbm [thread:$0]  (%p1261_p13), %s581_s10, 128, %s583_s19, %s565_s15  }
  0xdf PF: > { %p917_p12 = scmp.ge.s32.totalorder %s1146_s17, 2  ;;  %s594_s29 = sand.u32 1, %s1126_s12  }
  0xe0   : > { %s595_s11 = scalar_lea.sflag [#allocation5], %s594_s29 }
  0xe1   : > { %p911_p2 = pnand %p917_p12, %p1265_p0 }
  0xe3   : > { %p912_p3 = pneg %p911_p2 }
  0xe5   : > { %1121 = dma.done.wait (%p912_p3), %s595_s11, 128  }
  0xe6   : > { %1123 = vsyncadd (%p912_p3), %s595_s11, 4294967168  ;;  %s20_s17 = sadd.s32 1, %s1146_s17   ;;  %s1420_s12 = smov %s1130_s13 }
  0xe7   : > { %p17_p1 = scmp.ge.s32.totalorder %s20_s17, 5   ;;  %s1421_s13 = smov %s1134_s14 }
  0xe8   : > { %s1422_s14 = smov %s1223_s25  ;;  %s1423_s15 = smov %s1142_s16 }
  0xe9   : > { %s1424_s16 = smov %s1426_s18  ;;  %19 = sbr.rel (!%p17_p1) target bundleno = 7 (0x7), region = 102 }
  0xee   :  { %601 = vsyncpa [#allocation4], 1 }
  0xef   :  { %603 = vsyncpa [#allocation4 + $0x1], 1 }
  0xf0   :  { %604 = vsyncpa [#allocation7], 1 }
  0xf1   :  { %606 = vsyncpa [#allocation7 + $0x1], 1 }
  0xf2   :  { %607 = vsyncpa [#allocation5], 1 }
  0xf3   :  { %609 = vsyncpa [#allocation5 + $0x1], 1 }

</bundles_post_ra>
